<compile_context>
chip_gen: v5e
topology: v5e:2x2
jax: 0.10.0
libtpu: 0.0.40
codegen_flags: <defaults>
</compile_context>

<pallas_src>
import jax
import jax.numpy as jnp
from jax import lax
from jax.experimental import pallas as pl
from jax.experimental.pallas import tpu as pltpu


def _default_vmem_limit():
    """Per-generation scoped-VMEM limit: ~3/4 of physical, capped at 96 MiB."""
    try:
        info = pltpu.get_tpu_info()
        cap = getattr(info, "vmem_capacity_bytes", None)
        if cap:
            return int(min(cap * 3 // 4, 96 * 1024 * 1024))
    except Exception:
        pass
    return 48 * 1024 * 1024  # safe on v5e/v6e (128 MiB) and v7x (64 MiB)


def _make_kernel(B, tb, need_row_mask, compute_probs):
    def kernel(logits_ref, mask_ref, counts_ref, num_ref, *out_refs):
        if compute_probs:
            probs_ref, part_ref = out_refs
        else:
            (part_ref,) = out_refs

        # Cast in-register; inputs stay in their narrow dtypes in HBM/VMEM.
        x = logits_ref[...].astype(jnp.float32)        # (tb, N)
        m_f32 = mask_ref[...].astype(jnp.float32)      # (tb, N), {0, 1}
        counts = counts_ref[...].astype(jnp.float32)   # (tb, N)
        n_lab = num_ref[...].astype(jnp.float32)       # (tb, 1)

        elem_valid = m_f32 != 0.0
        if need_row_mask:
            # Partial last tile: out-of-bounds rows hold garbage reads; mask
            # them out of the loss (jnp.where, not multiply, so NaN/Inf from
            # garbage logits cannot leak into the partial sums).
            row = (lax.broadcasted_iota(jnp.int32, (tb, 1), 0)
                   + pl.program_id(0) * tb)
            elem_valid = jnp.logical_and(elem_valid, row < B)

        # Exact per-row reciprocal (per-row cost is negligible; rows with
        # num_labelers == 0 are clamped to 1 by design).
        inv_n = 1.0 / jnp.maximum(n_lab, 1.0)
        y = counts * inv_n                              # soft targets in [0, 1]

        # Shared transcendental: e = exp(-|x|) feeds both sigmoid and softplus.
        e = jnp.exp(-jnp.abs(x))

        # Numerically stable BCE-with-logits against soft targets, masked.
        per_elem = jnp.maximum(x, 0.0) - x * y + jnp.log1p(e)
        masked = jnp.where(elem_valid, per_elem, 0.0)

        # Per-tile partial reduction -> SMEM output; final masked mean in
        # the wrapper (keeps the grid axis fully "parallel").
        part_ref[0, 0] = jnp.sum(masked)
        part_ref[0, 1] = jnp.sum(elem_valid.astype(jnp.float32))

        if compute_probs:
            inv_1pe = pl.reciprocal(1.0 + e, approx=True)
            sig = jnp.where(x >= 0.0, inv_1pe, e * inv_1pe)   # == sigmoid(x)
            probs_ref[...] = (sig * m_f32).astype(probs_ref.dtype)

    return kernel


def set_classifier_forward(logits, mask, label_counts, num_labelers, *,
                           tile_b=None, probs_dtype=jnp.bfloat16,
                           compute_probs=True, vmem_limit_bytes=None):
    """logits: (B, N) float; mask: (B, N) int (0/1, int8 preferred);
    label_counts: (B, N) int (int8 preferred); num_labelers: (B,) or (B, 1) int.

    Returns (probs (B, N) probs_dtype or None, loss () f32).
    probs = sigmoid(logits) * mask; loss = masked mean BCE-with-logits against
    label_counts / num_labelers.  Set compute_probs=False for loss-only mode
    (drops the probs HBM stream and one transcendental per element)."""
    B, N = logits.shape
    num2d = jnp.reshape(num_labelers, (B, 1))

    if vmem_limit_bytes is None:
        vmem_limit_bytes = _default_vmem_limit()
    vmem_limit_bytes = int(vmem_limit_bytes)

    # HBM/VMEM bytes per batch row across all streams, in native dtypes
    # (no padded or upcast copies are ever materialized).
    bytes_per_row = N * (jnp.dtype(logits.dtype).itemsize
                         + jnp.dtype(mask.dtype).itemsize
                         + jnp.dtype(label_counts.dtype).itemsize)
    if compute_probs:
        bytes_per_row += N * jnp.dtype(probs_dtype).itemsize
    bytes_per_row += jnp.dtype(num2d.dtype).itemsize

    ALIGN = 32  # covers f32 (8), bf16 (16) and int8 (32) sublane packing
    if B <= ALIGN:
        tb = B  # single full-extent tile (exempt from the 8-divisibility rule)
    else:
        # Largest 32-aligned tile fitting the double-buffered VMEM budget.
        budget = (vmem_limit_bytes * 7 // 10) // 2
        cap = max(ALIGN, (budget // max(bytes_per_row, 1)) // ALIGN * ALIGN)
        if tile_b is not None:
            cap = min(cap, max(ALIGN, (int(tile_b) // ALIGN) * ALIGN))
        # Keep at least two grid steps so both v7x TensorCores get work.
        two_way = ((-(-B // 2) + ALIGN - 1) // ALIGN) * ALIGN
        tb = max(ALIGN, min(cap, two_way))

    n_tiles = -(-B // tb)  # cdiv
    need_row_mask = (B % tb) != 0

    kernel = _make_kernel(B, tb, need_row_mask, compute_probs)

    in_specs = [
        pl.BlockSpec((tb, N), lambda i: (i, 0)),   # logits
        pl.BlockSpec((tb, N), lambda i: (i, 0)),   # mask (native dtype)
        pl.BlockSpec((tb, N), lambda i: (i, 0)),   # label_counts (native dtype)
        pl.BlockSpec((tb, 1), lambda i: (i, 0)),   # num_labelers
    ]
    out_specs = []
    out_shapes = []
    if compute_probs:
        out_specs.append(pl.BlockSpec((tb, N), lambda i: (i, 0)))
        out_shapes.append(jax.ShapeDtypeStruct((B, N), probs_dtype))
    out_specs.append(pl.BlockSpec((1, 2), lambda i: (i, 0),
                                  memory_space=pltpu.SMEM))
    out_shapes.append(jax.ShapeDtypeStruct((n_tiles, 2), jnp.float32))

    results = pl.pallas_call(
        kernel,
        grid=(n_tiles,),
        in_specs=in_specs,
        out_specs=tuple(out_specs),
        out_shape=tuple(out_shapes),
        compiler_params=pltpu.CompilerParams(
            dimension_semantics=("parallel",),
            vmem_limit_bytes=vmem_limit_bytes),
    )(logits, mask, label_counts, num2d)

    if compute_probs:
        probs, partials = results
    else:
        (partials,) = results
        probs = None

    loss = jnp.sum(partials[:, 0]) / jnp.maximum(jnp.sum(partials[:, 1]), 1.0)
    return probs, loss


def _reference(logits, mask, label_counts, num_labelers):
    x = logits.astype(jnp.float32)
    m = mask.astype(jnp.float32)
    n = jnp.maximum(num_labelers.reshape(-1, 1).astype(jnp.float32), 1.0)
    y = label_counts.astype(jnp.float32) / n
    probs = jax.nn.sigmoid(x) * m
    per = jnp.maximum(x, 0.0) - x * y + jnp.log1p(jnp.exp(-jnp.abs(x)))
    loss = jnp.sum(per * m) / jnp.maximum(jnp.sum(m), 1.0)
    return probs, loss


def _make_inputs(key, B, N, num_labelers_val):
    k1, k2, k3 = jax.random.split(key, 3)
    logits = jax.random.normal(k1, (B, N), dtype=jnp.float32)
    mask = (jax.random.uniform(k2, (B, N)) > 0.25).astype(jnp.int8)
    label_counts = jax.random.randint(k3, (B, N), 0, num_labelers_val + 1)
    label_counts = (label_counts * mask).astype(jnp.int8)
    num_labelers = jnp.full((B,), num_labelers_val, dtype=jnp.int32)
    return logits, mask, label_counts, num_labelers


if __name__ == "__main__":
    key = jax.random.PRNGKey(0)
    ka, kb = jax.random.split(key)

    # --- Test 1: small batch, single full-extent tile, bf16 probs (default).
    B1, N1, NUM_LABELERS = 4, 16, 3
    logits, mask, counts, num = _make_inputs(ka, B1, N1, NUM_LABELERS)
    probs, loss = set_classifier_forward(logits, mask, counts, num)
    probs = jax.block_until_ready(probs)
    loss = jax.block_until_ready(loss)
    ref_probs, ref_loss = _reference(logits, mask, counts, num)
    assert jnp.allclose(probs.astype(jnp.float32), ref_probs,
                        atol=1e-2, rtol=2e-2)
    assert jnp.allclose(loss, ref_loss, atol=1e-4, rtol=1e-4)

    # --- Test 2: multi-tile grid with a partial last tile (row-mask path),
    # f32 probs, forced tile_b to exercise tb=32 / 2 tiles on B=40.
    B2, N2 = 40, 24
    logits2, mask2, counts2, num2 = _make_inputs(kb, B2, N2, NUM_LABELERS)
    probs2, loss2 = set_classifier_forward(logits2, mask2, counts2, num2,
                                           tile_b=32,
                                           probs_dtype=jnp.float32)
    probs2 = jax.block_until_ready(probs2)
    loss2 = jax.block_until_ready(loss2)
    ref_probs2, ref_loss2 = _reference(logits2, mask2, counts2, num2)
    # approx=True sigmoid reciprocal has ~1e-4 relative error.
    assert jnp.allclose(probs2, ref_probs2, atol=2e-3, rtol=2e-3)
    assert jnp.allclose(loss2, ref_loss2, atol=1e-4, rtol=1e-4)

    # --- Test 3: loss-only mode (no probs stream).
    none_probs, loss3 = set_classifier_forward(logits2, mask2, counts2, num2,
                                               tile_b=32, compute_probs=False)
    loss3 = jax.block_until_ready(loss3)
    assert none_probs is None
    assert jnp.allclose(loss3, ref_loss2, atol=1e-4, rtol=1e-4)

    print("KERNEL_OK")
</pallas_src>

<mosaic_0001>
module attributes {stable_mosaic.version = 11 : i64} {
  func.func @kernel(%arg0: i32, %arg1: memref<4x16xf32, #tpu.memory_space<vmem>>, %arg2: memref<4x16xi8, #tpu.memory_space<vmem>>, %arg3: memref<4x16xi8, #tpu.memory_space<vmem>>, %arg4: memref<4x1xi32, #tpu.memory_space<vmem>>, %arg5: memref<4x16xbf16, #tpu.memory_space<vmem>>, %arg6: memref<1x2xf32, #tpu.memory_space<smem>>) attributes {dimension_semantics = [#tpu.dimension_semantics<parallel>], iteration_bounds = array<i64: 1>, scalar_prefetch = 0 : i64, scratch_operands = 0 : i64, tpu.core_type = #tpu.core_type<tc>, window_params = [{transform_indices = @transform_0, window_bounds = array<i64: 4, 16>}, {transform_indices = @transform_1, window_bounds = array<i64: 4, 16>}, {transform_indices = @transform_2, window_bounds = array<i64: 4, 16>}, {transform_indices = @transform_3, window_bounds = array<i64: 4, 1>}, {transform_indices = @transform_4, window_bounds = array<i64: 4, 16>}, {transform_indices = @transform_5, window_bounds = array<i64: 1, 2>}]} {
    %c0 = arith.constant 0 : index
    %c0_0 = arith.constant 0 : index
    %0 = vector.load %arg1[%c0, %c0_0] : memref<4x16xf32, #tpu.memory_space<vmem>>, vector<4x16xf32>
    %c0_1 = arith.constant 0 : index
    %c0_2 = arith.constant 0 : index
    %1 = vector.load %arg2[%c0_1, %c0_2] : memref<4x16xi8, #tpu.memory_space<vmem>>, vector<4x16xi8>
    %2 = arith.sitofp %1 : vector<4x16xi8> to vector<4x16xf32>
    %c0_3 = arith.constant 0 : index
    %c0_4 = arith.constant 0 : index
    %3 = vector.load %arg3[%c0_3, %c0_4] : memref<4x16xi8, #tpu.memory_space<vmem>>, vector<4x16xi8>
    %4 = arith.sitofp %3 : vector<4x16xi8> to vector<4x16xf32>
    %c0_5 = arith.constant 0 : index
    %c0_6 = arith.constant 0 : index
    %5 = vector.load %arg4[%c0_5, %c0_6] : memref<4x1xi32, #tpu.memory_space<vmem>>, vector<4x1xi32>
    %6 = arith.sitofp %5 : vector<4x1xi32> to vector<4x1xf32>
    %cst = arith.constant 0.000000e+00 : f32
    %7 = vector.broadcast %cst : f32 to vector<4x16xf32>
    %8 = arith.cmpf one, %2, %7 : vector<4x16xf32>
    %cst_7 = arith.constant 1.000000e+00 : f32
    %9 = vector.broadcast %cst_7 : f32 to vector<4x1xf32>
    %10 = arith.maximumf %6, %9 : vector<4x1xf32>
    %cst_8 = arith.constant 1.000000e+00 : f32
    %11 = vector.broadcast %cst_8 : f32 to vector<4x1xf32>
    %12 = arith.divf %11, %10 : vector<4x1xf32>
    %13 = vector.broadcast %12 : vector<4x1xf32> to vector<4x16xf32>
    %14 = arith.mulf %4, %13 : vector<4x16xf32>
    %15 = math.absf %0 : vector<4x16xf32>
    %cst_9 = arith.constant 0.000000e+00 : f32
    %16 = vector.broadcast %cst_9 : f32 to vector<4x16xf32>
    %17 = arith.subf %16, %15 : vector<4x16xf32>
    %18 = math.exp %17 : vector<4x16xf32>
    %cst_10 = arith.constant 0.000000e+00 : f32
    %19 = vector.broadcast %cst_10 : f32 to vector<4x16xf32>
    %20 = arith.maximumf %0, %19 : vector<4x16xf32>
    %21 = arith.mulf %0, %14 : vector<4x16xf32>
    %22 = arith.subf %20, %21 : vector<4x16xf32>
    %23 = math.log1p %18 : vector<4x16xf32>
    %24 = arith.addf %22, %23 : vector<4x16xf32>
    %cst_11 = arith.constant 0.000000e+00 : f32
    %25 = vector.broadcast %cst_11 : f32 to vector<4x16xf32>
    %26 = arith.select %8, %24, %25 : vector<4x16xi1>, vector<4x16xf32>
    %27 = vector.shape_cast %26 : vector<4x16xf32> to vector<1x4x16xf32>
    %cst_12 = arith.constant dense<0.000000e+00> : vector<1xf32>
    %28 = vector.multi_reduction <add>, %27, %cst_12 [1, 2] : vector<1x4x16xf32> to vector<1xf32>
    %29 = vector.shape_cast %28 : vector<1xf32> to vector<1x1x1xf32>
    %30 = vector.extract %29[0, 0, 0] : f32 from vector<1x1x1xf32>
    %c0_13 = arith.constant 0 : index
    %c0_14 = arith.constant 0 : index
    %31 = memref.load %arg6[%c0_13, %c0_14] : memref<1x2xf32, #tpu.memory_space<smem>>
    memref.store %30, %arg6[%c0_13, %c0_14] : memref<1x2xf32, #tpu.memory_space<smem>>
    %32 = arith.extui %8 : vector<4x16xi1> to vector<4x16xi32>
    %33 = arith.sitofp %32 : vector<4x16xi32> to vector<4x16xf32>
    %34 = vector.shape_cast %33 : vector<4x16xf32> to vector<1x4x16xf32>
    %cst_15 = arith.constant dense<0.000000e+00> : vector<1xf32>
    %35 = vector.multi_reduction <add>, %34, %cst_15 [1, 2] : vector<1x4x16xf32> to vector<1xf32>
    %36 = vector.shape_cast %35 : vector<1xf32> to vector<1x1x1xf32>
    %37 = vector.extract %36[0, 0, 0] : f32 from vector<1x1x1xf32>
    %c0_16 = arith.constant 0 : index
    %c1 = arith.constant 1 : index
    %38 = memref.load %arg6[%c0_16, %c1] : memref<1x2xf32, #tpu.memory_space<smem>>
    memref.store %37, %arg6[%c0_16, %c1] : memref<1x2xf32, #tpu.memory_space<smem>>
    %cst_17 = arith.constant 1.000000e+00 : f32
    %39 = vector.broadcast %cst_17 : f32 to vector<4x16xf32>
    %40 = arith.addf %39, %18 : vector<4x16xf32>
    %41 = tpu.reciprocal %40 {approx = true} : vector<4x16xf32> -> vector<4x16xf32>
    %cst_18 = arith.constant 0.000000e+00 : f32
    %42 = vector.broadcast %cst_18 : f32 to vector<4x16xf32>
    %43 = arith.cmpf oge, %0, %42 : vector<4x16xf32>
    %44 = arith.mulf %18, %41 : vector<4x16xf32>
    %45 = arith.select %43, %41, %44 : vector<4x16xi1>, vector<4x16xf32>
    %46 = arith.mulf %45, %2 : vector<4x16xf32>
    %47 = arith.truncf %46 : vector<4x16xf32> to vector<4x16xbf16>
    %c0_19 = arith.constant 0 : index
    %c0_20 = arith.constant 0 : index
    %48 = vector.load %arg5[%c0_19, %c0_20] : memref<4x16xbf16, #tpu.memory_space<vmem>>, vector<4x16xbf16>
    tpu.vector_store %arg5[%c0_19, %c0_20], %47 {strides = array<i32>} : memref<4x16xbf16, #tpu.memory_space<vmem>>, vector<4x16xbf16>,
    return
  }
  func.func @transform_0(%arg0: i32) -> (i32, i32) {
    %c0_i32 = arith.constant 0 : i32
    %c0_i32_0 = arith.constant 0 : i32
    return %arg0, %c0_i32 : i32, i32
  }
  func.func @transform_1(%arg0: i32) -> (i32, i32) {
    %c0_i32 = arith.constant 0 : i32
    %c0_i32_0 = arith.constant 0 : i32
    return %arg0, %c0_i32 : i32, i32
  }
  func.func @transform_2(%arg0: i32) -> (i32, i32) {
    %c0_i32 = arith.constant 0 : i32
    %c0_i32_0 = arith.constant 0 : i32
    return %arg0, %c0_i32 : i32, i32
  }
  func.func @transform_3(%arg0: i32) -> (i32, i32) {
    %c0_i32 = arith.constant 0 : i32
    %c0_i32_0 = arith.constant 0 : i32
    return %arg0, %c0_i32 : i32, i32
  }
  func.func @transform_4(%arg0: i32) -> (i32, i32) {
    %c0_i32 = arith.constant 0 : i32
    %c0_i32_0 = arith.constant 0 : i32
    return %arg0, %c0_i32 : i32, i32
  }
  func.func @transform_5(%arg0: i32) -> (i32, i32) {
    %c0_i32 = arith.constant 0 : i32
    %c0_i32_0 = arith.constant 0 : i32
    return %arg0, %c0_i32 : i32, i32
  }
}

</mosaic_0001>

<bundles_post_ra>
// kernel: tpu_custom_call.1
= control target key start
LH: loop header
LB: loop body
LE: loop exit
PB: predicated region body
PF: predicated region fallthrough
CT: control target
= control target key end

     0   :  { %11 = vsyncpa [#allocation3], 0  ;;  %s295_s0 = inlined_call_operand.vmem [shape: f32[4,16], index: 0, kind: input, shape index: {}]   ;;  %s296_s1 = inlined_call_operand.vmem [shape: s8[4,16], index: 1, kind: input, shape index: {}]   ;;  %s297_s2 = inlined_call_operand.hbm [shape: s8[4,16], index: 2, kind: input, shape index: {}]   ;;  %s298_s3 = inlined_call_operand.vmem [shape: s32[4,1], index: 3, kind: input, shape index: {}]   ;;  %s299_s4 = inlined_call_operand.hbm [shape: bf16[4,16], index: 4, kind: output, shape index: {0}]   ;;  %s300_s5 = inlined_call_operand.hbm [shape: f32[1,2], index: 5, kind: output, shape index: {1}]  }
   0x1   :  { %12 = vsyncpa [#allocation4], 0 }
   0x2   :  { %13 = vsyncpa [#allocation5], 0  ;;  %s23_s20 = sshll.u32 %s297_s2, 4  ;;  %s238_s21 = smov [#allocation2]   ;;  %s24_s20 = int_to_ptr.hbm [resolvable:$true] %s23_s20 }
   0x3   :  { %s25_s22 = sshll.u32 %s238_s21, 4  ;;  %s26_s22 = int_to_ptr.vmem [resolvable:$true] %s25_s22 }
   0x4   :  { %28 = dma.hbm_to_vmem [thread:$0]  %s24_s20, 16, %s26_s22, [#allocation3]  }
   0x5   :  { %232 = dma.done.wait [#allocation3], 16  }
   0x6   :  { %233 = vsyncadd [#allocation3], 4294967280  ;;  %v239_v0 = vmov 0   ;;  %v42_v1 = vld [vmem:[%s298_s3] sm:$0xf]  ;;  %vm85_vm5 = vcmask 125952  }
   0x7   :  { %163 = vset.pattern.permute.xlu0 %v239_v0  ;;  %v43_v2 = vcvt.s32.f32 %v42_v1  ;;  %v35_v14 = vld [vmem:[%s295_s0] sm:$0xf]  ;;  %v240_v22 = vmov 0.0   ;;  %s241_s0 = smov [#allocation6]   ;;  %s128_s29 = sshll.u32 %s299_s4, 4  ;;  %vm119_vm8 = vcmask 123904   ;;  %s129_s29 = int_to_ptr.hbm [resolvable:$true] %s128_s29 }
   0x8   :  { %v67_v15 = vand.u32 2147483647, %v35_v14  ;;  %v36_v18 = vld [vmem:[%s296_s1] sm:$0x1]  ;;  %vm114_vm6 = vcmp.ge.f32.partialorder %v35_v14, 0.0  ;;  %v71_v41 = vmax.f32 %v35_v14, 0.0 }
   0x9   :  { %v45_v3 = vmax.f32 %v43_v2, 1.0  ;;  %v37_v19 = vunpack.c.0.s8 %v36_v18  ;;  %v39_v30 = vld [vmem:[#allocation2] sm:$0x1]  ;;  %s126_s1 = sshll.u32 %s241_s0, 4  ;;  %s137_s7 = sshll.u32 %s300_s5, 4  ;;  %s127_s1 = int_to_ptr.vmem [resolvable:$true] %s126_s1  ;;  %s138_s7 = int_to_ptr.hbm [resolvable:$true] %s137_s7 }
   0xa   :  { %v68_v16 = vsub.f32 0.0, %v67_v15  ;;  %v40_v32 = vunpack.c.0.s8 %v39_v30  ;;  %s242_s10 = smov [#allocation7]  }
   0xb   :  { %164 = vrcp.f32 %v45_v3  ;;  %v57_v6 = vand.u32 2147483648, %v45_v3  ;;  %vm51_vm0 = vweird.f32 %v45_v3  ;;  %v55_v8 = vand.u32 2147483647, %v45_v3 }
   0xc   :  { %v69_v17 = vmul.f32 1.442695, %v68_v16  ;;  %v38_v21 = vcvt.s32.f32 %v37_v19  ;;  %v41_v35 = vcvt.s32.f32 %v40_v32 }
   0xd   :  { %v58_v10 = vor.u32 1.1754944e-38, %v57_v6  ;;  %vm56_vm3 = vcmp.eq.f32.partialorder %v55_v8, 8.507059e+37 }
   0xe   :  { %166 = vpow2.f32 %v69_v17  ;;  %vm44_vm4 = vcmp.ne.f32.partialorder %v38_v21, 0.0 }
   0xf   :  { %v153_v23 = vsel %vm44_vm4, 1.0, %v240_v22 }
  0x10   :  { %v100_v25 = vsel %vm85_vm5, %v153_v23, 0.0 }
  0x11   :  { %v165_v4 = vpop.eup %164  ;;  %101 = vadd.xlane.f32.xlu1 %v100_v25 }
  0x12   :  { %v47_v5 = vmul.f32 %v165_v4, %v45_v3  ;;  %vm52_vm1 = vweird.f32 %v165_v4 }
  0x13   :  { %vm53_vm2 = vmor %vm51_vm0, %vm52_vm1 }
  0x14   :  { %v48_v7 = vsub.f32 1.0, %v47_v5  ;;  %v167_v20 = vpop.eup %166 }
  0x15   :  { %v74_v24 = vadd.f32 1.0, %v167_v20  ;;  %v77_v31 = vmul.f32 -0.5, %v167_v20  ;;  %v80_v36 = vand.u32 2147483647, %v167_v20 }
  0x16   :  { %v49_v9 = vmul.f32 %v165_v4, %v48_v7 }
  0x17   :  { %168 = vrcp.f32 %v74_v24  ;;  %v78_v33 = vadd.f32 1.0, %v77_v31  ;;  %vm81_vm7 = vcmp.lt.f32.partialorder %v80_v36, 0.0004427343 }
  0x18   :  { %v50_v11 = vadd.f32 %v165_v4, %v49_v9  ;;  %170 = vlog2.f32 %v74_v24 }
  0x19   :  { %v79_v39 = vmul.f32 %v167_v20, %v78_v33 }
  0x1a   :  { %v54_v12 = vsel %vm53_vm2, %v165_v4, %v50_v11 }
  0x1b   :  { %v59_v13 = vsel %vm56_vm3, %v58_v10, %v54_v12 }
  0x1c   :  { %63 = vperm.xlu0 %163, %v59_v13  }
  0x1d   :  { %v169_v26 = vpop.eup %168 }
  0x1e   :  { %v115_v27 = vmul.f32 %v169_v26, %v167_v20  ;;  %v171_v34 = vpop.eup %170 }
  0x1f   :  { %v76_v38 = vmul.f32 0.6931472, %v171_v34 }
  0x20   :  { %v116_v28 = vsel %vm114_vm6, %v169_v26, %v115_v27 }
  0x21   :  { %v117_v29 = vmul.f32 %v116_v28, %v38_v21  ;;  %v82_v43 = vsel %vm81_vm7, %v79_v39, %v76_v38 }
  0x23   :  { %v118_v62 = vpack.c.bf16 %v117_v29, %v117_v29 }
  0x25   :  { %120 = vst.msk [vmem:[#allocation6] sm:$0x3] %vm119_vm8, %v118_v62 }
  0x26   :  { %131 = dma.vmem_to_hbm [thread:$0]  %s127_s1, 32, %s129_s29, [#allocation4]  }
  0x84   :  { %v102_v48 = vpop.xlane.xlu1 %101 }
  0x85   :  { %v103_v49 = vrot.slane %v102_v48, 4 }
  0x87   :  { %v104_v50 = vadd.f32 %v103_v49, %v102_v48 }
  0x89   :  { %v105_v51 = vrot.slane %v104_v50, 2 }
  0x8b   :  { %v106_v55 = vadd.f32 %v105_v51, %v104_v50 }
  0x8d   :  { %v107_v58 = vrot.slane %v106_v55, 1 }
  0x8e   :  { %v64_v37 = vpop.permute.xlu0 %63 }
  0x8f   :  { %v66_v40 = vmul.f32 %v64_v37, %v41_v35  ;;  %v108_v61 = vadd.f32 %v107_v58, %v106_v55 }
  0x91   :  { %v72_v42 = vmul.f32 %v66_v40, %v35_v14 }
  0x93   :  { %v73_v44 = vsub.f32 %v71_v41, %v72_v42 }
  0x95   :  { %v83_v45 = vadd.f32 %v82_v43, %v73_v44 }
  0x97   :  { %v84_v46 = vsel %vm44_vm4, %v83_v45, 0.0 }
  0x98   :  { %v86_v47 = vsel %vm85_vm5, %v84_v46, 0.0 }
  0x99   :  { %87 = vadd.xlane.f32.xlu0 %v86_v47 }
 0x10c   :  { %v88_v52 = vpop.xlane.xlu0 %87 }
 0x10d   :  { %v89_v53 = vrot.slane %v88_v52, 4 }
 0x10f   :  { %v90_v54 = vadd.f32 %v89_v53, %v88_v52 }
 0x111   :  { %v91_v56 = vrot.slane %v90_v54, 2 }
 0x113   :  { %v92_v57 = vadd.f32 %v91_v56, %v90_v54 }
 0x115   :  { %v93_v59 = vrot.slane %v92_v57, 1 }
 0x117   :  { %v94_v60 = vadd.f32 %v93_v59, %v92_v57 }
 0x119   :  { %154 = vpush %v94_v60 }
 0x11a   :  { %156 = vpush %v108_v61 }
 0x14a   :  { %s155_s8 = spop %154 }
 0x14b   :  { %97 = sst [smem:[#allocation7]] %s155_s8  ;;  %s157_s9 = spop %156 }
 0x14c   :  { %111 = sst [smem:[#allocation7 + $0x1]] %s157_s9 }
 0x14d   :  { %140 = dma.smem_to_hbm %s242_s10, 16, %s138_s7, [#allocation5]  }
 0x14e   :  { %234 = dma.done.wait [#allocation4], 32  }
 0x14f   :  { %235 = vsyncadd [#allocation4], 4294967264 }
 0x150   :  { %236 = dma.done.wait [#allocation5], 16  }
 0x151   :  { %237 = vsyncadd [#allocation5], 4294967280 }
 0x152   :  { %149 = sfence }
 0x153   :  { %150 = vsyncpa [#allocation3], 1 }
 0x154   :  { %151 = vsyncpa [#allocation4], 1 }
 0x155   :  { %152 = vsyncpa [#allocation5], 1 }

</bundles_post_ra>
